<compile_context>
chip_gen: v5e
topology: v5e:2x2
jax: 0.10.0
libtpu: 0.0.40
codegen_flags: <defaults>
</compile_context>

<pallas_src>
import functools

import numpy as np

import jax
import jax.numpy as jnp
from jax.experimental import pallas as pl
from jax.experimental.pallas import tpu as pltpu


def _round_up(v, m):
    return ((v + m - 1) // m) * m


# ------------------------------ fused kernel ------------------------------- #

def _fused_shufflenet_kernel(x_ref, wtap_ref, bconv_ref, wfc_ref, bfc_ref,
                             out_ref, *, Hp, Wp, ncls):
    """Fused stage1 conv + maxpool + global avgpool + linear + softmax.

    x_ref:     (Bblk, S, 27)   bf16 conv patches, S = 4*(Hp+1)*(Wp+1),
                               spatial axis ordered (row_phase, col_phase, i, j)
    wtap_ref:  (27, CoutP)     bf16 conv weights, lanes zero-padded to 128
    bconv_ref: (1, CoutP)      f32
    wfc_ref:   (CoutP, NclsP)  f32
    bfc_ref:   (1, NclsP)      f32
    out_ref:   (Bblk, 1, NclsP) softmax probabilities (padded lanes = 0)
    """
    Bblk, S, K = x_ref.shape
    CoutP = wtap_ref.shape[-1]
    NclsP = wfc_ref.shape[-1]
    Hp1, Wp1 = Hp + 1, Wp + 1
    assert S == 4 * Hp1 * Wp1

    # ---- Conv 3x3 s2 p1 (+bias): ONE (Bblk*S, 27) @ (27, CoutP) MXU dot.
    lhs = x_ref[...].reshape(Bblk * S, K)                       # bf16
    conv = jnp.dot(lhs, wtap_ref[...],
                   preferred_element_type=jnp.float32)          # (Bblk*S, CoutP)
    conv = conv + bconv_ref[...]

    # ---- MaxPool 3x3 s2 p1, vectorized.  The wrapper laid the conv output out
    # as (rp, cp, i, j) where conv row = 2i+rp-1, col = 2j+cp-1 (out-of-range
    # clamped to an in-window duplicate, so clipping == PyTorch's -inf pad).
    # Pool window (i, j) = {(rp=0,i),(rp=1,i),(rp=0,i+1)} x {(cp=0,j),(cp=1,j),
    # (cp=0,j+1)} -> 8 whole-slab maximums over contiguous shifted views.
    y = conv.reshape(Bblk, 4, Hp1, Wp1, CoutP)                  # phase p = 2*rp + cp
    rm0 = jnp.maximum(jnp.maximum(y[:, 0, :Hp], y[:, 2, :Hp]), y[:, 0, 1:Hp1])
    rm1 = jnp.maximum(jnp.maximum(y[:, 1, :Hp], y[:, 3, :Hp]), y[:, 1, 1:Hp1])
    pool = jnp.maximum(jnp.maximum(rm0[:, :, :Wp], rm1[:, :, :Wp]),
                       rm0[:, :, 1:Wp1])                        # (Bblk, Hp, Wp, CoutP)

    # ---- Global average pool -> batched FC -> masked softmax -> one store.
    feat = jnp.sum(pool, axis=(1, 2)) * (1.0 / float(Hp * Wp))  # (Bblk, CoutP)
    logits = jnp.dot(feat, wfc_ref[...],
                     preferred_element_type=jnp.float32) + bfc_ref[...]
    lane = jax.lax.broadcasted_iota(jnp.int32, (1, NclsP), 1)
    logits = jnp.where(lane < ncls, logits, -1e30)              # mask padded lanes
    m = jnp.max(logits, axis=-1, keepdims=True)
    e = jnp.exp(logits - m)
    probs = e / jnp.sum(e, axis=-1, keepdims=True)              # padded lanes -> 0
    out_ref[...] = probs.reshape(Bblk, 1, NclsP).astype(out_ref.dtype)


# ------------------------------ JAX wrapper -------------------------------- #

def shufflenet_forward(x_nchw, params, *, block_batch=None):
    """params = (w_conv (Cout,Cin,3,3), b_conv (Cout,), w_fc (ncls,Cout),
    b_fc (ncls,)) in PyTorch layouts.  Returns (B, ncls) softmax probs."""
    w_conv, b_conv, w_fc, b_fc = params
    B, Cin, H, W = x_nchw.shape
    Cout = w_conv.shape[0]
    ncls = w_fc.shape[0]

    LANES = 128
    CoutP = _round_up(Cout, LANES)
    NclsP = _round_up(ncls, LANES)

    # conv 3x3 s2 p1 and maxpool 3x3 s2 p1 output sizes (PyTorch floor formulas)
    Ho = (H + 2 - 3) // 2 + 1
    Wo = (W + 2 - 3) // 2 + 1
    Hp = (Ho + 2 - 3) // 2 + 1
    Wp = (Wo + 2 - 3) // 2 + 1
    Hp1, Wp1 = Hp + 1, Wp + 1
    K = 9 * Cin
    S = 4 * Hp1 * Wp1

    # --- wrapper-side tap stacking (im2col), ordered by pooling phases.
    # For (rp, cp, i, j): conv position (r, c) = (2i+rp-1, 2j+cp-1), clamped
    # into range (the clamp duplicates an in-window value, so the in-kernel
    # max matches PyTorch's -inf-padded maxpool exactly).
    x = jnp.transpose(x_nchw, (0, 2, 3, 1)).astype(jnp.float32)   # NHWC
    xpad = jnp.pad(x, ((0, 0), (1, 1), (1, 1), (0, 0)))           # (B, H+2, W+2, Cin)

    p_arr = np.arange(4)
    rp, cp = p_arr // 2, p_arr % 2
    a_arr = np.arange(Hp1)
    b_arr = np.arange(Wp1)
    r = np.clip(2 * a_arr[None, :, None] + rp[:, None, None] - 1, 0, Ho - 1)
    c = np.clip(2 * b_arr[None, None, :] + cp[:, None, None] - 1, 0, Wo - 1)
    r = np.broadcast_to(r, (4, Hp1, Wp1))
    c = np.broadcast_to(c, (4, Hp1, Wp1))
    dy = np.arange(3)
    dx = np.arange(3)
    rin = np.broadcast_to(2 * r[..., None, None] + dy[:, None],
                          (4, Hp1, Wp1, 3, 3)).reshape(-1)
    cin = np.broadcast_to(2 * c[..., None, None] + dx[None, :],
                          (4, Hp1, Wp1, 3, 3)).reshape(-1)
    flat_idx = jnp.asarray((rin * (W + 2) + cin).astype(np.int32))
    xflat = xpad.reshape(B, (H + 2) * (W + 2), Cin)
    patches = jnp.take(xflat, flat_idx, axis=1).reshape(B, S, K)
    patches = patches.astype(jnp.bfloat16)                        # (B, S, 27)

    # --- weights: (kh, kw, cin) flattening matches the patch K axis; lane-pad
    # to 128 with zeros (exact: padded channels stay 0 through the whole net).
    w_k = jnp.transpose(w_conv, (2, 3, 1, 0)).reshape(K, Cout)
    w_k = jnp.pad(w_k, ((0, 0), (0, CoutP - Cout))).astype(jnp.bfloat16)
    b_row = jnp.pad(b_conv.astype(jnp.float32).reshape(1, Cout),
                    ((0, 0), (0, CoutP - Cout)))
    wfc = jnp.pad(jnp.transpose(w_fc, (1, 0)).astype(jnp.float32),
                  ((0, CoutP - Cout), (0, NclsP - ncls)))
    bfc = jnp.pad(b_fc.astype(jnp.float32).reshape(1, ncls),
                  ((0, 0), (0, NclsP - ncls)))

    # --- block sizing from PADDED VMEM tile sizes: keep ~>= min(B, 8) grid
    # steps for pipelining / the two v7x TensorCores, and stay under ~40 MiB
    # resident (v7x has 64 MiB physical VMEM; v5e/v6e have 128 MiB).
    in_tile = _round_up(S, 16) * LANES * 2          # bf16 patch block, per image
    conv_slab = _round_up(S, 8) * CoutP * 4         # f32 conv result, per image
    per_img = 2 * in_tile + 4 * conv_slab           # dbl-buffered input + pool temps
    vmem_budget = 40 * 1024 * 1024
    bb_vmem = max(1, vmem_budget // per_img)
    if block_batch is None:
        target_steps = B if B < 8 else 8
        block_batch = max(1, B // target_steps)
    bb = int(max(1, min(block_batch, bb_vmem, B)))
    while B % bb:
        bb -= 1
    grid = (B // bb,)

    kernel = functools.partial(_fused_shufflenet_kernel, Hp=Hp, Wp=Wp, ncls=ncls)

    out = pl.pallas_call(
        kernel,
        out_shape=jax.ShapeDtypeStruct((B, 1, NclsP), jnp.float32),
        grid_spec=pltpu.PrefetchScalarGridSpec(
            num_scalar_prefetch=0,
            grid=grid,
            in_specs=[
                pl.BlockSpec((bb, S, K), lambda b: (b, 0, 0)),
                pl.BlockSpec((K, CoutP), lambda b: (0, 0)),
                pl.BlockSpec((1, CoutP), lambda b: (0, 0)),
                pl.BlockSpec((CoutP, NclsP), lambda b: (0, 0)),
                pl.BlockSpec((1, NclsP), lambda b: (0, 0)),
            ],
            out_specs=pl.BlockSpec((bb, 1, NclsP), lambda b: (b, 0, 0)),
        ),
        compiler_params=pltpu.CompilerParams(
            dimension_semantics=("parallel",),
            # 64 MiB: == physical on v7x, well under v5e/v6e's 128 MiB; the
            # block-size heuristic keeps actual use under ~40 MiB.
            vmem_limit_bytes=64 * 1024 * 1024,
        ),
    )(patches, w_k, b_row, wfc, bfc)

    return out[:, 0, :ncls]


# --------------------------- pure-JAX reference ---------------------------- #

def _reference_forward(x_nchw, params):
    w_conv, b_conv, w_fc, b_fc = params
    x = jnp.transpose(x_nchw, (0, 2, 3, 1)).astype(jnp.float32)
    w_hwio = jnp.transpose(w_conv, (2, 3, 1, 0)).astype(jnp.float32)
    y = jax.lax.conv_general_dilated(
        x, w_hwio, window_strides=(2, 2), padding=((1, 1), (1, 1)),
        dimension_numbers=("NHWC", "HWIO", "NHWC"))
    y = y + b_conv.reshape(1, 1, 1, -1)
    y = jax.lax.reduce_window(
        y, -jnp.inf, jax.lax.max,
        window_dimensions=(1, 3, 3, 1), window_strides=(1, 2, 2, 1),
        padding=((0, 0), (1, 1), (1, 1), (0, 0)))
    feat = jnp.mean(y, axis=(1, 2))
    logits = feat @ jnp.transpose(w_fc) + b_fc
    return jax.nn.softmax(logits, axis=1)


# ---------------------------------- main ----------------------------------- #

if __name__ == "__main__":
    B, Cin, H, W = 2, 3, 16, 16
    Cout, ncls = 24, 2

    key = jax.random.PRNGKey(0)
    k1, k2, k3, k4, k5 = jax.random.split(key, 5)
    w_conv = jax.random.normal(k1, (Cout, Cin, 3, 3), jnp.float32) * 0.1  # torch layout
    b_conv = jax.random.normal(k2, (Cout,), jnp.float32) * 0.1
    w_fc = jax.random.normal(k3, (ncls, Cout), jnp.float32) * 0.1         # torch layout
    b_fc = jax.random.normal(k4, (ncls,), jnp.float32) * 0.1
    x = jax.random.normal(k5, (B, Cin, H, W), jnp.float32)                # NCHW input

    params = (w_conv, b_conv, w_fc, b_fc)

    out = jax.block_until_ready(shufflenet_forward(x, params))
    ref = jax.block_until_ready(_reference_forward(x, params))

    assert out.shape == (B, ncls), out.shape
    # bf16 conv inputs/weights (f32 accumulation) -> compare at 1e-2 as advised.
    assert jnp.allclose(out, ref, atol=1e-2, rtol=1e-2), (out, ref)

    print("KERNEL_OK")
</pallas_src>

<mosaic_0001>
module attributes {stable_mosaic.version = 11 : i64} {
  func.func @_fused_shufflenet_kernel(%arg0: i32, %arg1: memref<1x100x27xbf16, #tpu.memory_space<vmem>>, %arg2: memref<27x128xbf16, #tpu.memory_space<vmem>>, %arg3: memref<1x128xf32, #tpu.memory_space<vmem>>, %arg4: memref<128x128xf32, #tpu.memory_space<vmem>>, %arg5: memref<1x128xf32, #tpu.memory_space<vmem>>, %arg6: memref<1x1x128xf32, #tpu.memory_space<vmem>>) attributes {dimension_semantics = [#tpu.dimension_semantics<parallel>], iteration_bounds = array<i64: 2>, scalar_prefetch = 0 : i64, scratch_operands = 0 : i64, tpu.core_type = #tpu.core_type<tc>, window_params = [{transform_indices = @transform_0, window_bounds = array<i64: 1, 100, 27>}, {pipeline_mode = #tpu.pipeline_mode<synchronous>, transform_indices = @transform_1, window_bounds = array<i64: 27, 128>}, {pipeline_mode = #tpu.pipeline_mode<synchronous>, transform_indices = @transform_2, window_bounds = array<i64: 1, 128>}, {pipeline_mode = #tpu.pipeline_mode<synchronous>, transform_indices = @transform_3, window_bounds = array<i64: 128, 128>}, {pipeline_mode = #tpu.pipeline_mode<synchronous>, transform_indices = @transform_4, window_bounds = array<i64: 1, 128>}, {transform_indices = @transform_5, window_bounds = array<i64: 1, 1, 128>}]} {
    %c0 = arith.constant 0 : index
    %c0_0 = arith.constant 0 : index
    %c0_1 = arith.constant 0 : index
    %0 = vector.load %arg1[%c0, %c0_0, %c0_1] : memref<1x100x27xbf16, #tpu.memory_space<vmem>>, vector<1x100x27xbf16>
    %1 = vector.shape_cast %0 : vector<1x100x27xbf16> to vector<100x27xbf16>
    %c0_2 = arith.constant 0 : index
    %c0_3 = arith.constant 0 : index
    %2 = vector.load %arg2[%c0_2, %c0_3] : memref<27x128xbf16, #tpu.memory_space<vmem>>, vector<27x128xbf16>
    %cst = arith.constant dense<0.000000e+00> : vector<100x128xf32>
    %3 = tpu.matmul %1, %2, %cst {dimension_numbers = #tpu.dot_dimension_numbers<[1], [0], [0], [1], [0, 0, 1, 1], [], []>} : vector<100x27xbf16>, vector<27x128xbf16>, vector<100x128xf32> -> vector<100x128xf32>
    %c0_4 = arith.constant 0 : index
    %c0_5 = arith.constant 0 : index
    %4 = vector.load %arg3[%c0_4, %c0_5] : memref<1x128xf32, #tpu.memory_space<vmem>>, vector<1x128xf32>
    %5 = vector.broadcast %4 : vector<1x128xf32> to vector<100x128xf32>
    %6 = arith.addf %3, %5 : vector<100x128xf32>
    %7 = vector.shape_cast %6 : vector<100x128xf32> to vector<1x4x5x5x128xf32>
    %8 = vector.extract_strided_slice %7 {offsets = [0, 0, 0, 0, 0], sizes = [1, 1, 4, 5, 128], strides = [1, 1, 1, 1, 1]} : vector<1x4x5x5x128xf32> to vector<1x1x4x5x128xf32>
    %9 = vector.shape_cast %8 : vector<1x1x4x5x128xf32> to vector<1x4x5x128xf32>
    %10 = vector.extract_strided_slice %7 {offsets = [0, 2, 0, 0, 0], sizes = [1, 1, 4, 5, 128], strides = [1, 1, 1, 1, 1]} : vector<1x4x5x5x128xf32> to vector<1x1x4x5x128xf32>
    %11 = vector.shape_cast %10 : vector<1x1x4x5x128xf32> to vector<1x4x5x128xf32>
    %12 = arith.maximumf %9, %11 : vector<1x4x5x128xf32>
    %13 = vector.extract_strided_slice %7 {offsets = [0, 0, 1, 0, 0], sizes = [1, 1, 4, 5, 128], strides = [1, 1, 1, 1, 1]} : vector<1x4x5x5x128xf32> to vector<1x1x4x5x128xf32>
    %14 = vector.shape_cast %13 : vector<1x1x4x5x128xf32> to vector<1x4x5x128xf32>
    %15 = arith.maximumf %12, %14 : vector<1x4x5x128xf32>
    %16 = vector.extract_strided_slice %7 {offsets = [0, 1, 0, 0, 0], sizes = [1, 1, 4, 5, 128], strides = [1, 1, 1, 1, 1]} : vector<1x4x5x5x128xf32> to vector<1x1x4x5x128xf32>
    %17 = vector.shape_cast %16 : vector<1x1x4x5x128xf32> to vector<1x4x5x128xf32>
    %18 = vector.extract_strided_slice %7 {offsets = [0, 3, 0, 0, 0], sizes = [1, 1, 4, 5, 128], strides = [1, 1, 1, 1, 1]} : vector<1x4x5x5x128xf32> to vector<1x1x4x5x128xf32>
    %19 = vector.shape_cast %18 : vector<1x1x4x5x128xf32> to vector<1x4x5x128xf32>
    %20 = arith.maximumf %17, %19 : vector<1x4x5x128xf32>
    %21 = vector.extract_strided_slice %7 {offsets = [0, 1, 1, 0, 0], sizes = [1, 1, 4, 5, 128], strides = [1, 1, 1, 1, 1]} : vector<1x4x5x5x128xf32> to vector<1x1x4x5x128xf32>
    %22 = vector.shape_cast %21 : vector<1x1x4x5x128xf32> to vector<1x4x5x128xf32>
    %23 = arith.maximumf %20, %22 : vector<1x4x5x128xf32>
    %24 = vector.extract_strided_slice %15 {offsets = [0, 0, 0, 0], sizes = [1, 4, 4, 128], strides = [1, 1, 1, 1]} : vector<1x4x5x128xf32> to vector<1x4x4x128xf32>
    %25 = vector.extract_strided_slice %23 {offsets = [0, 0, 0, 0], sizes = [1, 4, 4, 128], strides = [1, 1, 1, 1]} : vector<1x4x5x128xf32> to vector<1x4x4x128xf32>
    %26 = arith.maximumf %24, %25 : vector<1x4x4x128xf32>
    %27 = vector.extract_strided_slice %15 {offsets = [0, 0, 1, 0], sizes = [1, 4, 4, 128], strides = [1, 1, 1, 1]} : vector<1x4x5x128xf32> to vector<1x4x4x128xf32>
    %28 = arith.maximumf %26, %27 : vector<1x4x4x128xf32>
    %cst_6 = arith.constant dense<0.000000e+00> : vector<1x128xf32>
    %29 = vector.multi_reduction <add>, %28, %cst_6 [1, 2] : vector<1x4x4x128xf32> to vector<1x128xf32>
    %cst_7 = arith.constant 6.250000e-02 : f32
    %30 = vector.broadcast %cst_7 : f32 to vector<1x128xf32>
    %31 = arith.mulf %29, %30 : vector<1x128xf32>
    %c0_8 = arith.constant 0 : index
    %c0_9 = arith.constant 0 : index
    %32 = vector.load %arg4[%c0_8, %c0_9] : memref<128x128xf32, #tpu.memory_space<vmem>>, vector<128x128xf32>
    %cst_10 = arith.constant dense<0.000000e+00> : vector<1x128xf32>
    %33 = tpu.matmul %31, %32, %cst_10 {dimension_numbers = #tpu.dot_dimension_numbers<[1], [0], [0], [1], [0, 0, 1, 1], [], []>} : vector<1x128xf32>, vector<128x128xf32>, vector<1x128xf32> -> vector<1x128xf32>
    %c0_11 = arith.constant 0 : index
    %c0_12 = arith.constant 0 : index
    %34 = vector.load %arg5[%c0_11, %c0_12] : memref<1x128xf32, #tpu.memory_space<vmem>>, vector<1x128xf32>
    %35 = arith.addf %33, %34 : vector<1x128xf32>
    %36 = tpu.iota {dimensions = array<i32: 1>} : vector<1x128xi32>
    %c2_i32 = arith.constant 2 : i32
    %37 = vector.broadcast %c2_i32 : i32 to vector<1x128xi32>
    %38 = arith.cmpi slt, %36, %37 : vector<1x128xi32>
    %cst_13 = arith.constant -1.000000e+30 : f32
    %39 = vector.broadcast %cst_13 : f32 to vector<1x128xf32>
    %40 = arith.select %38, %35, %39 : vector<1x128xi1>, vector<1x128xf32>
    %cst_14 = arith.constant dense<0xFF800000> : vector<1xf32>
    %41 = vector.multi_reduction <maximumf>, %40, %cst_14 [1] : vector<1x128xf32> to vector<1xf32>
    %42 = vector.shape_cast %41 : vector<1xf32> to vector<1x1xf32>
    %43 = vector.broadcast %42 : vector<1x1xf32> to vector<1x128xf32>
    %44 = arith.subf %40, %43 : vector<1x128xf32>
    %45 = math.exp %44 : vector<1x128xf32>
    %cst_15 = arith.constant dense<0.000000e+00> : vector<1xf32>
    %46 = vector.multi_reduction <add>, %45, %cst_15 [1] : vector<1x128xf32> to vector<1xf32>
    %47 = vector.shape_cast %46 : vector<1xf32> to vector<1x1xf32>
    %48 = vector.broadcast %47 : vector<1x1xf32> to vector<1x128xf32>
    %49 = arith.divf %45, %48 : vector<1x128xf32>
    %50 = vector.shape_cast %49 : vector<1x128xf32> to vector<1x1x128xf32>
    %c0_16 = arith.constant 0 : index
    %c0_17 = arith.constant 0 : index
    %c0_18 = arith.constant 0 : index
    %51 = vector.load %arg6[%c0_16, %c0_17, %c0_18] : memref<1x1x128xf32, #tpu.memory_space<vmem>>, vector<1x1x128xf32>
    tpu.vector_store %arg6[%c0_16, %c0_17, %c0_18], %50 {strides = array<i32>} : memref<1x1x128xf32, #tpu.memory_space<vmem>>, vector<1x1x128xf32>,
    return
  }
  func.func @transform_0(%arg0: i32) -> (i32, i32, i32) {
    %c0_i32 = arith.constant 0 : i32
    %c0_i32_0 = arith.constant 0 : i32
    %c0_i32_1 = arith.constant 0 : i32
    return %arg0, %c0_i32, %c0_i32_0 : i32, i32, i32
  }
  func.func @transform_1(%arg0: i32) -> (i32, i32) {
    %c0_i32 = arith.constant 0 : i32
    %c0_i32_0 = arith.constant 0 : i32
    %c0_i32_1 = arith.constant 0 : i32
    return %c0_i32, %c0_i32_0 : i32, i32
  }
  func.func @transform_2(%arg0: i32) -> (i32, i32) {
    %c0_i32 = arith.constant 0 : i32
    %c0_i32_0 = arith.constant 0 : i32
    %c0_i32_1 = arith.constant 0 : i32
    return %c0_i32, %c0_i32_0 : i32, i32
  }
  func.func @transform_3(%arg0: i32) -> (i32, i32) {
    %c0_i32 = arith.constant 0 : i32
    %c0_i32_0 = arith.constant 0 : i32
    %c0_i32_1 = arith.constant 0 : i32
    return %c0_i32, %c0_i32_0 : i32, i32
  }
  func.func @transform_4(%arg0: i32) -> (i32, i32) {
    %c0_i32 = arith.constant 0 : i32
    %c0_i32_0 = arith.constant 0 : i32
    %c0_i32_1 = arith.constant 0 : i32
    return %c0_i32, %c0_i32_0 : i32, i32
  }
  func.func @transform_5(%arg0: i32) -> (i32, i32, i32) {
    %c0_i32 = arith.constant 0 : i32
    %c0_i32_0 = arith.constant 0 : i32
    %c0_i32_1 = arith.constant 0 : i32
    return %arg0, %c0_i32, %c0_i32_0 : i32, i32, i32
  }
}

</mosaic_0001>

<bundles_post_ra>
// kernel: tpu_custom_call.1
= control target key start
LH: loop header
LB: loop body
LE: loop exit
PB: predicated region body
PF: predicated region fallthrough
CT: control target
= control target key end

     0   :  { %10 = vsyncpa [#allocation3], 0  ;;  %s1413_s0 = inlined_call_operand.vmem [shape: bf16[2,100,27], index: 0, kind: input, shape index: {}]   ;;  %s1414_s1 = inlined_call_operand.hbm [shape: bf16[27,128], index: 1, kind: input, shape index: {}]   ;;  %s1415_s2 = inlined_call_operand.vmem [shape: f32[1,128], index: 2, kind: input, shape index: {}]   ;;  %s1416_s3 = inlined_call_operand.vmem [shape: f32[128,128], index: 3, kind: input, shape index: {}]   ;;  %s1417_s4 = inlined_call_operand.vmem [shape: f32[1,128], index: 4, kind: input, shape index: {}]   ;;  %s1418_s5 = inlined_call_operand.hbm [shape: f32[2,1,128], index: 5, kind: output, shape index: {}]  }
   0x1   :  { %11 = vsyncpa [#allocation4], 0 }
   0x2   :  { %13 = vsyncpa [#allocation4 + $0x1], 0  ;;  %s1088_s18 = smov 0   ;;  %s1090_s19 = smov 0  }
   0x3   :  { %s1092_s20 = smov 0   ;;  %s1094_s21 = smov 0  }
   0x4 LB: > { %s1109_s22 = sadd.s32 4294967295, %s1052_s21   ;;  %s837_s23 = sadd.s32 4294967294, %s1052_s21   ;;  %s1052_s21 = sphi %s1094_s21, %s1424_s21   ;;  %s1048_s20 = sphi %s1092_s20, %s1423_s20   ;;  %s1044_s19 = sphi %s1090_s19, %s1422_s19   ;;  %s1040_s18 = sphi %s1088_s18, %s1421_s18  }
   0x5   : > { %s1113_s24 = sadd.s32 1, %s1052_s21   ;;  %s136_s25 = sadd.s32 1, %s1048_s20 }
   0x6   : > { %s133_s26 = ssub.s32 %s1052_s21, %s1113_s24  ;;  %p146_p0 = scmp.ne.s32.totalorder %s1048_s20, %s1044_s19 }
   0x7   : > { %p134_p1 = scmp.eq.s32.totalorder %s133_s26, 0  ;;  %p147_p2 = scmp.eq.s32.totalorder %s1109_s22, 1 }
   0x8   : > { %p152_p3 = scmp.ne.s32.totalorder %s1044_s19, %s1040_s18  ;;  %p153_p4 = scmp.eq.s32.totalorder %s837_s23, 1 }
   0x9   : > { %s1124_s27 = scalar_select %p134_p1, %s1048_s20, %s136_s25  }
   0xa   : > { %p1126_p5 = por %p147_p2, %p146_p0  ;;  %p1130_p6 = por %p153_p4, %p152_p3 }
   0xb   : > { %p838_p7 = scmp.ge.s32.totalorder %s1052_s21, 1  ;;  %p160_p8 = scmp.lt.s32.totalorder %s1052_s21, 3 }
   0xc   : > { %p912_p9 = scmp.eq.s32.totalorder %s1109_s22, 0  ;;  %s171_s7 = sshll.u32 %s1414_s1, 4  ;;  %s172_s7 = int_to_ptr.hbm [resolvable:$true] %s171_s7 }
   0xd   : > { %p161_p10 = pnand %p838_p7, %p160_p8  ;;  %s1054_s8 = smov [#allocation2]  }
   0xe   : > { %s173_s9 = sshll.u32 %s1054_s8, 4  ;;  %s1055_s10 = smov 64   ;;  %s174_s9 = int_to_ptr.vmem [resolvable:$true] %s173_s9 }
   0xf   : > { %p904_p11 = pneg %p161_p10  ;;  %s1056_s11 = smov 4  }
  0x10   : > { %206 = sbr.rel (%p161_p10) target bundleno = 657 (0x291), region = 40 }
  0x11   : > { %p905_p12 = pnand %p912_p9, %p904_p11 }
  0x13   : > { %907 = dma.hbm_to_vmem [thread:$0]  (!%p905_p12), %s172_s7, 256, %s174_s9, [#allocation3], %s1055_s10, %s1055_s10, %s1056_s11  }
  0x15   : > { %1031 = dma.done.wait (%p912_p9), [#allocation3], 256  }
  0x16   : > { %1033 = vsyncadd (%p912_p9), [#allocation3], 4294967040  ;;  %p234_p13 = scmp.lt.s32.totalorder %s1109_s22, 1  ;;  %vm327_vm0 = vcmask 1044480   ;;  %vm328_vm1 = vcmask 1045504   ;;  %v1057_v0 = vmov 65535   ;;  %s766_s9 = scalar_lea.hbm %s1418_s5, %s1109_s22 }
  0x17   : > { %v329_v1 = vsel %vm327_vm0, 4294967295, %v1057_v0  ;;  %v874_v2 = vld [vmem:[#allocation2 + $0x8] sm:$0xf]  ;;  %v892_v3 = vld [vmem:[#allocation2 + $0x8] sm:$0x30]  ;;  %v891_v7 = vld [vmem:[#allocation2] sm:$0xff] }
  0x18   : > { %s235_s12 = scalar_select %p234_p13, %s1109_s22, 1  ;;  %v330_v4 = vsel %vm328_vm1, %v329_v1, 0  ;;  %v875_v5 = vor.u32 %v892_v3, %v874_v2  ;;  %vm305_vm2 = vcmask 220160   ;;  %v1170_v18 = vld [vmem:[%s1415_s2] ss:$0 sm:$0xff]  ;;  %v705_v28 = vld [vmem:[%s1416_s3 + $0x78] sm:$0xff] }
  0x19   : > { %v704_v29 = vld [vmem:[%s1416_s3 + $0x70] sm:$0xff]  ;;  %707 = vmatpush.msra.mxu1 %v705_v28  ;;  %v703_v35 = vld [vmem:[%s1416_s3 + $0x68] sm:$0xff]  ;;  %v702_v44 = vld [vmem:[%s1416_s3 + $0x60] sm:$0xff]  ;;  %vm675_vm3 = vcmask 1043456   ;;  %vm731_vm5 = vcmask 1040384   ;;  %s1006_s23 = scalar_lea.hbm %s1418_s5, 2 }
  0x1a   : > { %s897_s13 = smul.u32 52, %s235_s12  ;;  %v332_v6 = vand.u32 %v875_v5, %v330_v4  ;;  %v701_v54 = vld [vmem:[%s1416_s3 + $0x58] sm:$0xff]  ;;  %v700_v1 = vld [vmem:[%s1416_s3 + $0x50] sm:$0xff]  ;;  %s770_s12 = sshll.u32 %s766_s9, 4  ;;  %s771_s12 = int_to_ptr.hbm [resolvable:$true] %s770_s12 }
  0x1b   : > { %708 = vmatpush.msra.mxu1 %v704_v29  ;;  %s1000_s14 = sshra.s32 %s771_s12, 4  ;;  %s1001_s14 = int_to_ptr.hbm [resolvable:$true] %s1000_s14 }
  0x1c   : > { %340 = vmatpush.bf16.msra.mxu0 %v332_v6  ;;  %893 = vmatpush.bf16.msra.mxu2 %v332_v6  ;;  %s1151_s16 = scalar_lea.vmem %s1413_s0, %s897_s13  ;;  %s1002_s15 = scalar_lea.hbm %s1001_s14, 1 }
  0x1d   : > { %894 = vmatpush.bf16.msra.mxu3 %v332_v6  ;;  %v885_v8 = vld [vmem:[%s1151_s16] sm:$0xff]  ;;  %v888_v9 = vld [vmem:[%s1151_s16 + $0x18] sm:$0xff]  ;;  %v886_v11 = vld [vmem:[%s1151_s16 + $0x8] sm:$0xff]  ;;  %709 = vmatpush.msra.mxu1 %v703_v35  ;;  %p1003_p0 = scmp.ne.s32.totalorder %s1001_s14, %s1002_s15  ;;  %p1007_p3 = scmp.lt.s32.totalorder %s1001_s14, %s1418_s5 }
  0x1e   : > { %v889_v10 = vld [vmem:[%s1151_s16 + $0x20] sm:$0xff]  ;;  %v890_v12 = vld [vmem:[%s1151_s16 + $0x28] sm:$0xff]  ;;  %v887_v13 = vld [vmem:[%s1151_s16 + $0x10] sm:$0xff]  ;;  %p1008_p4 = scmp.lt.s32.totalorder %s1006_s23, %s1002_s15 }
  0x1f   : > { %710 = vmatpush.msra.mxu1 %v702_v44  ;;  %p1004_p1 = pnand %p1003_p0, %p1126_p5 }
  0x20   : > { %341 = vmatpush.bf16.msra.mxu0 %v891_v7  ;;  %895 = vmatpush.bf16.msra.mxu2 %v891_v7  ;;  %p1009_p7 = por %p1008_p4, %p1007_p3 }
  0x21   : > { %896 = vmatpush.bf16.msra.mxu3 %v891_v7  ;;  %711 = vmatpush.msra.mxu1 %v701_v54  ;;  %p1005_p2 = pneg %p1004_p1 }
  0x23   : > { %876 = vmatmul.msk.bf16.vlgmr.msra.gmra.mxu0 %vm305_vm2, %v885_v8  ;;  %879 = vmatmul.msk.bf16.vlgmr.msra.gmra.mxu2 %vm305_vm2, %v888_v9  ;;  %p1010_p8 = pnand %p1009_p7, %p1005_p2 }
  0x24   : > { %880 = vmatmul.msk.bf16.vlgmr.msra.gmra.mxu3 %vm305_vm2, %v889_v10  ;;  %712 = vmatpush.msra.mxu1 %v700_v1 }
  0x33   : > { %877 = vmatmul.msk.bf16.gmra.mxu0 %vm305_vm2, %v886_v11 }
  0x34   : > { %881 = vmatmul.msk.bf16.gmra.mxu3 %vm305_vm2, %v890_v12 }
  0x43   : > { %878 = vmatmul.msk.bf16.gmra.mxu0 %vm305_vm2, %v887_v13 }
  0xa0   : > { %v343_v14 = vpop.f32.mrf.mxu0 }
  0xa1   : > { %v1178_v22 = vadd.f32 %v1170_v18, %v343_v14  ;;  %v699_v14 = vld [vmem:[%s1416_s3 + $0x48] sm:$0xff] }
  0xa2   : > { %713 = vmatpush.msra.mxu1 %v699_v14 }
  0xa3   : > { %v388_v26 = vrot.slane %v1178_v22, 1  ;;  %v389_v31 = vrot.slane %v1178_v22, 2  ;;  %v390_v40 = vrot.slane %v1178_v22, 3  ;;  %v391_v41 = vrot.slane %v1178_v22, 4 }
  0xa4   : > { %v392_v42 = vrot.slane %v1178_v22, 5  ;;  %v393_v43 = vrot.slane %v1178_v22, 6  ;;  %v394_v0 = vrot.slane %v1178_v22, 7 }
  0xa6   : > { %v358_v17 = vpop.f32.mrf.mxu2 }
  0xa7   : > { %v1165_v16 = vpop.f32.mrf.mxu3  ;;  %v1175_v20 = vadd.f32 %v1170_v18, %v358_v17 }
  0xa8   : > { %v345_v15 = vpop.f32.mrf.mxu0  ;;  %v1258_v28 = vadd.f32 %v1170_v18, %v1165_v16 }
  0xa9   : > { %v426_v23 = vrot.slane %v1175_v20, 2  ;;  %v427_v24 = vrot.slane %v1175_v20, 3  ;;  %v428_v32 = vrot.slane %v1175_v20, 4  ;;  %v429_v50 = vrot.slane %v1175_v20, 5 }
  0xaa   : > { %v430_v51 = vrot.slane %v1175_v20, 6  ;;  %v1225_v60 = vadd.f32 %v1170_v18, %v345_v15  ;;  %v431_v10 = vrot.slane %v1175_v20, 7 }
  0xab   : > { %v528_v33 = vmax.f32 %v1178_v22, %v426_v23  ;;  %v529_v34 = vmax.f32 %v388_v26, %v427_v24  ;;  %v530_v52 = vmax.f32 %v389_v31, %v428_v32  ;;  %v531_v6 = vmax.f32 %v390_v40, %v429_v50  ;;  %v697_v40 = vld [vmem:[%s1416_s3 + $0x38] sm:$0xff] }
  0xac   : > { %v532_v11 = vmax.f32 %v391_v41, %v430_v51  ;;  %v395_v24 = vrot.slane %v1225_v60, 1  ;;  %v696_v51 = vld [vmem:[%s1416_s3 + $0x30] sm:$0xff]  ;;  %v399_v1 = vrot.slane %v1225_v60, 5 }
  0xad   : > { %v548_v55 = vmax.f32 %v528_v33, %v392_v42  ;;  %v549_v56 = vmax.f32 %v529_v34, %v393_v43  ;;  %v550_v8 = vmax.f32 %v530_v52, %v394_v0  ;;  %v551_v32 = vmax.f32 %v531_v6, %v1225_v60 }
  0xae   : > { %v360_v57 = vpop.f32.mrf.mxu2  ;;  %v533_v33 = vmax.f32 %v392_v42, %v431_v10  ;;  %v552_v42 = vmax.f32 %v532_v11, %v395_v24 }
  0xaf   : > { %v365_v21 = vpop.f32.mrf.mxu3  ;;  %v1240_v7 = vadd.f32 %v1170_v18, %v360_v57  ;;  %v398_v57 = vrot.slane %v1225_v60, 4 }
  0xb0   : > { %v1172_v19 = vpop.f32.mrf.mxu0  ;;  %v1183_v25 = vadd.f32 %v1170_v18, %v365_v21 }
  0xb1   : > { %v432_v31 = vrot.slane %v1240_v7, 1  ;;  %v433_v35 = vrot.slane %v1240_v7, 2 }
  0xb2   : > { %v444_v36 = vrot.slane %v1183_v25, 3  ;;  %v445_v37 = vrot.slane %v1183_v25, 4  ;;  %v446_v61 = vrot.slane %v1183_v25, 5  ;;  %v447_v12 = vrot.slane %v1183_v25, 6 }
  0xb3   : > { %v535_v50 = vmax.f32 %v394_v0, %v432_v31 }
  0xb5   : > { %v555_v6 = vmax.f32 %v535_v50, %v398_v57 }
  0xb7   : > { %v368_v49 = vpop.f32.mrf.mxu3 }
  0xb8   : > { %v350_v27 = vpop.f32.mrf.mxu0  ;;  %v1229_v62 = vadd.f32 %v1170_v18, %v368_v49  ;;  %v434_v49 = vrot.slane %v1240_v7, 3 }
  0xb9   : > { %v1193_v30 = vadd.f32 %v1170_v18, %v350_v27  ;;  %v698_v27 = vld [vmem:[%s1416_s3 + $0x40] sm:$0xff] }
  0xba   : > { %v449_v15 = vrot.slane %v1229_v62, 2  ;;  %v448_v23 = vrot.slane %v1229_v62, 1  ;;  %v450_v25 = vrot.slane %v1229_v62, 3  ;;  %714 = vmatpush.msra.mxu1 %v698_v27  ;;  %v537_v10 = vmax.f32 %v395_v24, %v434_v49 }
  0xbb   : > { %v409_v38 = vrot.slane %v1193_v30, 1  ;;  %v410_v39 = vrot.slane %v1193_v30, 2  ;;  %v413_v45 = vrot.slane %v1193_v30, 6  ;;  %v414_v46 = vrot.slane %v1193_v30, 7 }
  0xbc   : > { %v411_v53 = vrot.slane %v1193_v30, 3  ;;  %v412_v2 = vrot.slane %v1193_v30, 4  ;;  %715 = vmatpush.msra.mxu1 %v697_v40  ;;  %v451_v14 = vrot.slane %v1229_v62, 5  ;;  %v1312_v24 = vadd.f32 %v1170_v18, %v1172_v19 }
  0xbd   : > { %v568_v47 = vmax.f32 %v409_v38, %v444_v36  ;;  %v569_v48 = vmax.f32 %v410_v39, %v445_v37  ;;  %v534_v37 = vmax.f32 %v393_v43, %v1240_v7  ;;  %v573_v41 = vmax.f32 %v414_v46, %v448_v23 }
  0xbe   : > { %v570_v9 = vmax.f32 %v411_v53, %v446_v61  ;;  %v571_v26 = vmax.f32 %v412_v2, %v447_v12  ;;  %v536_v53 = vmax.f32 %v1225_v60, %v433_v35  ;;  %v695_v61 = vld [vmem:[%s1416_s3 + $0x28] sm:$0xff]  ;;  %716 = vmatpush.msra.mxu1 %v696_v51  ;;  %v401_v2 = vrot.slane %v1225_v60, 7  ;;  %v690_v51 = vld [vmem:[%s1416_s3] sm:$0xff] }
  0xbf   : > { %v584_v58 = vmax.f32 %v568_v47, %v413_v45  ;;  %v585_v59 = vmax.f32 %v569_v48, %v414_v46  ;;  %v397_v48 = vrot.slane %v1225_v60, 3  ;;  %v437_v23 = vrot.slane %v1240_v7, 6 }
  0xc0   : > { %v353_v63 = vpop.f32.mrf.mxu0  ;;  %v556_v11 = vmax.f32 %v536_v53, %v399_v1  ;;  %717 = vmatpush.msra.mxu1 %v695_v61  ;;  %v453_v27 = vrot.slane %v1229_v62, 7  ;;  %v440_v61 = vrot.slane %v1258_v28, 2 }
  0xc1   : > { %v600_v3 = vmax.f32 %v548_v55, %v584_v58  ;;  %v601_v4 = vmax.f32 %v549_v56, %v585_v59  ;;  %v1237_v5 = vadd.f32 %v1170_v18, %v353_v63  ;;  %v572_v55 = vmax.f32 %v413_v45, %v1229_v62 }
  0xc2   : > { %v400_v63 = vrot.slane %v1225_v60, 6  ;;  %v554_v0 = vmax.f32 %v534_v37, %v397_v48  ;;  %v540_v49 = vmax.f32 %v398_v57, %v437_v23 }
  0xc3   : > { %v616_v13 = vmax.f32 %v600_v3, %v549_v56  ;;  %v586_v17 = vmax.f32 %v570_v9, %v1237_v5  ;;  %v617_v21 = vmax.f32 %v601_v4, %v550_v8  ;;  %v415_v22 = vrot.slane %v1237_v5, 1 }
  0xc4   : > { %v417_v34 = vrot.slane %v1237_v5, 4  ;;  %v418_v38 = vrot.slane %v1237_v5, 5  ;;  %v574_v16 = vmax.f32 %v1237_v5, %v449_v15  ;;  %v416_v43 = vrot.slane %v1237_v5, 3 }
  0xc5   : > { %648 = vst [vmem:[#allocation1] ss:$9 sm:$0xff] %v616_v13  ;;  %v602_v29 = vmax.f32 %v550_v8, %v586_v17  ;;  %v587_v36 = vmax.f32 %v571_v26, %v415_v22  ;;  %v575_v44 = vmax.f32 %v415_v22, %v450_v25  ;;  %v419_v46 = vrot.slane %v1237_v5, 6  ;;  %v694_v8 = vld [vmem:[%s1416_s3 + $0x20] sm:$0xff]  ;;  %v370_v17 = vpop.f32.mrf.mxu3  ;;  %v693_v22 = vld [vmem:[%s1416_s3 + $0x18] sm:$0xff] }
  0xc6   : > { %650 = vst [vmem:[#allocation1 + $0x1] ss:$9 sm:$0xff] %v617_v21  ;;  %v589_v52 = vmax.f32 %v573_v41, %v417_v34  ;;  %v396_v56 = vrot.slane %v1225_v60, 2  ;;  %v590_v58 = vmax.f32 %v574_v16, %v418_v38  ;;  %v435_v3 = vrot.slane %v1240_v7, 4  ;;  %718 = vmatpush.msra.mxu1 %v694_v8  ;;  %v691_v41 = vld [vmem:[%s1416_s3 + $0x8] sm:$0xff] }
  0xc7   : > { %v618_v39 = vmax.f32 %v602_v29, %v551_v32  ;;  %v603_v47 = vmax.f32 %v551_v32, %v587_v36  ;;  %v591_v45 = vmax.f32 %v575_v44, %v419_v46  ;;  %v588_v4 = vmax.f32 %v572_v55, %v416_v43 }
  0xc8   : > { %v355_v59 = vpop.f32.mrf.mxu0  ;;  %v605_v9 = vmax.f32 %v554_v0, %v589_v52  ;;  %v436_v13 = vrot.slane %v1240_v7, 5  ;;  %v553_v15 = vmax.f32 %v533_v33, %v396_v56  ;;  %v606_v21 = vmax.f32 %v555_v6, %v590_v58  ;;  %v692_v33 = vld [vmem:[%s1416_s3 + $0x10] sm:$0xff]  ;;  %719 = vmatpush.msra.mxu1 %v693_v22 }
  0xc9   : > { %652 = vst [vmem:[#allocation1 + $0x2] ss:$9 sm:$0xff] %v618_v39  ;;  %v619_v54 = vmax.f32 %v603_v47, %v552_v42  ;;  %v1302_v12 = vadd.f32 %v1170_v18, %v355_v59  ;;  %v452_v25 = vrot.slane %v1229_v62, 6  ;;  %v607_v26 = vmax.f32 %v556_v11, %v591_v45 }
  0xca   : > { %v538_v29 = vmax.f32 %v396_v56, %v435_v3  ;;  %v604_v31 = vmax.f32 %v553_v15, %v588_v4  ;;  %v438_v32 = vrot.slane %v1240_v7, 7  ;;  %v1321_v35 = vadd.f32 %v1170_v18, %v370_v17  ;;  %720 = vmatpush.msra.mxu1 %v692_v33 }
  0xcb   : > { %654 = vst [vmem:[#allocation1 + $0x3] ss:$9 sm:$0xff] %v619_v54  ;;  %v557_v19 = vmax.f32 %v537_v10, %v400_v63  ;;  %v621_v36 = vmax.f32 %v605_v9, %v555_v6  ;;  %v420_v37 = vrot.slane %v1302_v12, 1  ;;  %v539_v16 = vmax.f32 %v397_v48, %v436_v13 }
  0xcc   : > { %v576_v62 = vmax.f32 %v416_v43, %v451_v14  ;;  %v622_v39 = vmax.f32 %v606_v21, %v556_v11  ;;  %v421_v7 = vrot.slane %v1302_v12, 2  ;;  %v577_v18 = vmax.f32 %v417_v34, %v452_v25  ;;  %721 = vmatpush.msra.mxu1 %v691_v41 }
  0xcd   : > { %v402_v42 = vrot.slane %v1312_v24, 1  ;;  %v623_v44 = vmax.f32 %v607_v26, %v557_v19  ;;  %v422_v47 = vrot.slane %v1302_v12, 3  ;;  %v578_v48 = vmax.f32 %v418_v38, %v453_v27 }
  0xce   : > { %v620_v43 = vmax.f32 %v604_v31, %v554_v0  ;;  %v592_v50 = vmax.f32 %v576_v62, %v1302_v12  ;;  %v403_v34 = vrot.slane %v1312_v24, 2  ;;  %v541_v52 = vmax.f32 %v399_v1, %v438_v32  ;;  %722 = vmatpush.msra.mxu1 %v690_v51 }
  0xcf   : > { %v579_v53 = vmax.f32 %v419_v46, %v1321_v35  ;;  %v593_v54 = vmax.f32 %v577_v18, %v420_v37  ;;  %v439_v38 = vrot.slane %v1258_v28, 1  ;;  %v558_v55 = vmax.f32 %v538_v29, %v401_v2 }
  0xd0   : > { %v594_v56 = vmax.f32 %v578_v48, %v421_v7  ;;  %v559_v57 = vmax.f32 %v539_v16, %v1312_v24  ;;  %v454_v58 = vrot.slane %v1321_v35, 2  ;;  %v404_v5 = vrot.slane %v1312_v24, 3 }
  0xd1   : > { %v595_v59 = vmax.f32 %v579_v53, %v422_v47  ;;  %v560_v46 = vmax.f32 %v540_v49, %v402_v42  ;;  %v608_v0 = vmax.f32 %v558_v55, %v592_v50  ;;  %v441_v1 = vrot.slane %v1258_v28, 3 }
  0xd2   : > { %v1326_v40 = vld [vmem:[#allocation1] sm:$0xff]  ;;  %v442_v45 = vrot.slane %v1258_v28, 4  ;;  %v561_v3 = vmax.f32 %v541_v52, %v403_v34  ;;  %v609_v4 = vmax.f32 %v559_v57, %v593_v54  ;;  %v542_v6 = vmax.f32 %v400_v63, %v1258_v28 }
  0xd3   : > { %657 = vst [vmem:[#allocation1 + $0x1] ss:$9 sm:$0xff] %v621_v36  ;;  %v543_v8 = vmax.f32 %v401_v2, %v439_v38  ;;  %v455_v9 = vrot.slane %v1321_v35, 3  ;;  %v610_v10 = vmax.f32 %v560_v46, %v594_v56  ;;  %v456_v11 = vrot.slane %v1321_v35, 4 }
  0xd4   : > { %658 = vst [vmem:[#allocation1 + $0x2] ss:$9 sm:$0xff] %v622_v39  ;;  %v423_v13 = vrot.slane %v1302_v12, 5  ;;  %v580_v14 = vmax.f32 %v1302_v12, %v454_v58  ;;  %v611_v15 = vmax.f32 %v561_v3, %v595_v59  ;;  %v562_v17 = vmax.f32 %v542_v6, %v404_v5 }
  0xd5   : > { %659 = vst [vmem:[#allocation1 + $0x3] ss:$9 sm:$0xff] %v623_v44  ;;  %v457_v21 = vrot.slane %v1321_v35, 5  ;;  %v581_v22 = vmax.f32 %v420_v37, %v455_v9  ;;  %v624_v23 = vmax.f32 %v608_v0, %v559_v57  ;;  %v405_v63 = vrot.slane %v1312_v24, 4 }
  0xd6   : > { %656 = vst [vmem:[#allocation1] ss:$9 sm:$0xff] %v620_v43  ;;  %v406_v60 = vrot.slane %v1312_v24, 5  ;;  %v582_v2 = vmax.f32 %v421_v7, %v456_v11  ;;  %v625_v25 = vmax.f32 %v609_v4, %v560_v46  ;;  %v424_v27 = vrot.slane %v1302_v12, 6 }
  0xd7   : > { %v544_v29 = vmax.f32 %v1312_v24, %v440_v61  ;;  %v583_v31 = vmax.f32 %v422_v47, %v457_v21  ;;  %v626_v32 = vmax.f32 %v610_v10, %v561_v3  ;;  %v545_v33 = vmax.f32 %v402_v42, %v441_v1 }
  0xd8   : > { %v425_v19 = vrot.slane %v1302_v12, 7  ;;  %v596_v35 = vmax.f32 %v580_v14, %v423_v13  ;;  %v627_v36 = vmax.f32 %v611_v15, %v562_v17  ;;  %v546_v37 = vmax.f32 %v403_v34, %v442_v45  ;;  %v252_v13 = vld [vmem:[%s1151_s16 + $0x30] sm:$0x3]  ;;  %s232_s16 = sand.u32 1, %s1044_s19  }
  0xd9   : > { %v597_v16 = vmax.f32 %v581_v22, %v424_v27  ;;  %v407_v62 = vrot.slane %v1312_v24, 6  ;;  %v563_v39 = vmax.f32 %v543_v8, %v405_v63  ;;  %v443_v41 = vrot.slane %v1258_v28, 5  ;;  %s233_s10 = scalar_lea.vmem [#allocation5], %s232_s16  ;;  %s758_s13 = scalar_lea.sflag [#allocation4], %s232_s16 }
  0xda   : > { %v598_v7 = vmax.f32 %v582_v2, %v425_v19  ;;  %v408_v18 = vrot.slane %v1312_v24, 7  ;;  %v564_v44 = vmax.f32 %v544_v29, %v406_v60  ;;  %v599_v42 = vmax.f32 %v583_v31, %v1175_v20  ;;  %s768_s11 = sshll.u32 %s233_s10, 4  ;;  %s769_s11 = int_to_ptr.vmem [resolvable:$true] %s768_s11 }
  0xdb   : > { %v565_v47 = vmax.f32 %v545_v33, %v407_v62  ;;  %v612_v12 = vmax.f32 %v563_v39, %v596_v35  ;;  %v547_v50 = vmax.f32 %v404_v5, %v443_v41  ;;  %v676_v24 = vsel %vm675_vm3, %v1326_v40, 0.0  ;;  %v706_v40 = vld [vmem:[%s1417_s4] sm:$0x1] }
  0xdc   : > { %v566_v48 = vmax.f32 %v546_v37, %v408_v18  ;;  %v613_v43 = vmax.f32 %v564_v44, %v597_v16  ;;  %v727_v4 = vlaneseq  ;;  %v286_v14 = vunpack.c.l.b16 %v252_v13 }
  0xdd   : > { %v660_v26 = vld [vmem:[#allocation1] sm:$0xff]  ;;  %v614_v49 = vmax.f32 %v565_v47, %v598_v7  ;;  %v628_v34 = vmax.f32 %v612_v12, %v564_v44  ;;  %v567_v52 = vmax.f32 %v547_v50, %v1193_v30 }
  0xde   : > { %661 = vst [vmem:[#allocation1] ss:$9 sm:$0xff] %v624_v23  ;;  %v615_v51 = vmax.f32 %v566_v48, %v599_v42  ;;  %v629_v53 = vmax.f32 %v613_v43, %v565_v47  ;;  %v677_v20 = vsel %vm675_vm3, %v660_v26, 0.0  ;;  %v728_v6 = vand.u32 127, %v727_v4 }
  0xdf   : > { %662 = vst [vmem:[#allocation1 + $0x1] ss:$9 sm:$0xff] %v625_v25  ;;  %v630_v38 = vmax.f32 %v614_v49, %v566_v48  ;;  %v678_v56 = vadd.f32 %v677_v20, %v676_v24  ;;  %v293_v15 = vpack.c.b16 %v286_v14, %v286_v14 }
  0xe0   : > { %663 = vst [vmem:[#allocation1 + $0x2] ss:$9 sm:$0xff] %v626_v32  ;;  %v631_v28 = vmax.f32 %v615_v51, %v567_v52  ;;  %vm729_vm4 = vcmp.lt.s32.totalorder %v728_v6, 2 }
  0xe1   : > { %664 = vst [vmem:[#allocation1 + $0x3] ss:$9 sm:$0xff] %v627_v36  ;;  %882 = vmatmul.msk.bf16.gmra.mxu3 %vm305_vm2, %v293_v15 }
  0xe8   : > { %v665_v54 = vld [vmem:[#allocation1] sm:$0xff] }
  0xe9   : > { %666 = vst [vmem:[#allocation1] ss:$9 sm:$0xff] %v628_v34  ;;  %v679_v55 = vsel %vm675_vm3, %v665_v54, 0.0 }
  0xea   : > { %667 = vst [vmem:[#allocation1 + $0x1] ss:$9 sm:$0xff] %v629_v53  ;;  %v680_v58 = vadd.f32 %v679_v55, %v678_v56 }
  0xeb   : > { %668 = vst [vmem:[#allocation1 + $0x2] ss:$9 sm:$0xff] %v630_v38 }
  0xec   : > { %669 = vst [vmem:[#allocation1 + $0x3] ss:$9 sm:$0xff] %v631_v28 }
  0xf3   : > { %v670_v57 = vld [vmem:[#allocation1] sm:$0xff] }
  0xf4   : > { %v681_v59 = vsel %vm675_vm3, %v670_v57, 0.0 }
  0xf5   : > { %v682_v61 = vadd.f32 %v681_v59, %v680_v58 }
  0xf7   : > { %v683_v5 = vrot.slane %v682_v61, 4 }
  0xf9   : > { %v684_v30 = vadd.f32 %v683_v5, %v682_v61 }
  0xfb   : > { %v685_v46 = vrot.slane %v684_v30, 2 }
  0xfd   : > { %v686_v0 = vadd.f32 %v685_v46, %v684_v30 }
  0xff   : > { %v687_v1 = vrot.slane %v686_v0, 1 }
 0x101   : > { %v688_v45 = vadd.f32 %v687_v1, %v686_v0 }
 0x103   : > { %v689_v3 = vmul.f32 0.0625, %v688_v45 }
 0x105   : > { %723 = vmatmul.f32.vlgmr.msra.gmra.mxu1 %v689_v3 }
 0x164   : > { %v373_v60 = vpop.f32.mrf.mxu3 }
 0x16c   : > { %v374_v2 = vpop.f32.mrf.mxu3 }
 0x182   : > { %v724_v8 = vpop.f32.mrf.mxu1 }
 0x183   : > { %v725_v9 = vadd.f32 %v724_v8, %v706_v40 }
 0x185   : > { %v730_v10 = vsel %vm729_vm4, %v725_v9, -1e+30 }
 0x186   : > { %v732_v11 = vsel %vm731_vm5, %v730_v10, -inf }
 0x187   : > { %733 = vmax.xlane.f32.xlu0 %v732_v11 }
 0x1fa   : > { %v734_v17 = vpop.xlane.xlu0 %733 }
 0x1fb   : > { %v735_v21 = vsub.f32 %v730_v10, %v734_v17 }
 0x1fd   : > { %v736_v22 = vmul.f32 1.442695, %v735_v21 }
 0x1ff   : > { %952 = vpow2.f32 %v736_v22 }
 0x205   : > { %v953_v23 = vpop.eup %952 }
 0x206   : > { %v738_v63 = vsel %vm731_vm5, %v953_v23, 0.0 }
 0x207   : > { %739 = vadd.xlane.f32.xlu0 %v738_v63 }
 0x27a   : > { %v740_v25 = vpop.xlane.xlu0 %739 }
 0x27b   : > { %954 = vrcp.f32 %v740_v25  ;;  %v752_v31 = vand.u32 2147483648, %v740_v25  ;;  %v750_v33 = vand.u32 2147483647, %v740_v25  ;;  %vm746_vm7 = vweird.f32 %v740_v25 }
 0x27d   : > { %v753_v35 = vor.u32 1.1754944e-38, %v752_v31  ;;  %vm751_vm9 = vcmp.eq.f32.partialorder %v750_v33, 8.507059e+37 }
 0x281   : > { %v955_v26 = vpop.eup %954 }
 0x282   : > { %v742_v27 = vmul.f32 %v955_v26, %v740_v25  ;;  %vm747_vm6 = vweird.f32 %v955_v26 }
 0x283   : > { %vm748_vm8 = vmor %vm746_vm7, %vm747_vm6 }
 0x284   : > { %v743_v29 = vsub.f32 1.0, %v742_v27 }
 0x286   : > { %v744_v32 = vmul.f32 %v955_v26, %v743_v29 }
 0x288   : > { %v745_v19 = vadd.f32 %v955_v26, %v744_v32 }
 0x28a   : > { %v749_v36 = vsel %vm748_vm8, %v955_v26, %v745_v19 }
 0x28b   : > { %v754_v37 = vsel %vm751_vm9, %v753_v35, %v749_v36 }
 0x28c   : > { %v755_v16 = vmul.f32 %v953_v23, %v754_v37 }
 0x28e   : > { %756 = vst [vmem:[%s233_s10] sm:$0x1] %v755_v16 }
 0x28f   : > { %1013 = shalt.err (!%p1010_p8)
}
 0x290   : > { %902 = dma.vmem_to_hbm [thread:$0]  (%p1126_p5), %s769_s11, 16, %s771_s12, %s758_s13  }
 0x291 PF: > { %p914_p9 = scmp.ge.s32.totalorder %s1052_s21, 2  ;;  %s782_s30 = sand.u32 1, %s1040_s18  }
 0x292   : > { %s783_s6 = scalar_lea.sflag [#allocation4], %s782_s30 }
 0x293   : > { %p909_p10 = pnand %p914_p9, %p1130_p6 }
 0x295   : > { %p910_p11 = pneg %p909_p10 }
 0x297   : > { %1035 = dma.done.wait (%p910_p11), %s783_s6, 16  }
 0x298   : > { %1037 = vsyncadd (%p910_p11), %s783_s6, 4294967280  ;;  %p16_p12 = scmp.ge.s32.totalorder %s1113_s24, 4   ;;  %s1421_s18 = smov %s1044_s19 }
 0x299   : > { %s1422_s19 = smov %s1048_s20  ;;  %s1423_s20 = smov %s1124_s27 }
 0x29a   : > { %s1424_s21 = smov %s1113_s24  ;;  %18 = sbr.rel (!%p16_p12) target bundleno = 4 (0x4), region = 83 }
 0x29f   :  { %788 = vsyncpa [#allocation3], 1 }
 0x2a0   :  { %790 = vsyncpa [#allocation3 + $0x1], 1 }
 0x2a1   :  { %791 = vsyncpa [#allocation4], 1 }
 0x2a2   :  { %793 = vsyncpa [#allocation4 + $0x1], 1 }

</bundles_post_ra>
